<compile_context>
chip_gen: v7x
topology: tpu7x:2x2x1
jax: 0.10.0
libtpu: 0.0.40
codegen_flags: <defaults>
</compile_context>

<pallas_src>
import functools

import jax
import jax.numpy as jnp
from jax.experimental import pallas as pl
from jax.experimental.pallas import tpu as pltpu


def _round_up(x, m):
    return ((x + m - 1) // m) * m


def _apply_act(y, activation, *, in_kernel=False):
    if activation == "swish":
        if in_kernel:
            # exp and approximate reciprocal both issue on the EUP slot.
            return y * pl.reciprocal(1.0 + jnp.exp(-y), approx=True)
        return y * jax.nn.sigmoid(y)
    if activation == "relu":
        return jnp.maximum(y, 0.0)
    if activation == "tanh":
        return jnp.tanh(y)
    if activation == "leaky_relu":
        return jnp.where(y >= 0.0, y, 0.01 * y)
    raise NotImplementedError(f"Unknown activation {activation}")


def _actor_fused_kernel(*refs, out_dims, activation):
    """Fused MLP on one (TB, d_state) batch tile.

    refs = (x_ref, w0, w1, ..., w_last, bias_cat_ref, o_ref).
    Weights are bf16 (f32 accumulation); biases/activations stay f32.
    """
    x_ref = refs[0]
    o_ref = refs[-1]
    b_ref = refs[-2]          # (1, sum(out_dims)) f32, all biases concatenated
    w_refs = refs[1:-2]
    n_total = len(w_refs)

    h = x_ref[...]            # (TB, d_state) f32
    off = 0
    for layer in range(n_total):
        w = w_refs[layer][...]                     # (din, dout) bf16
        dout = out_dims[layer]
        b = b_ref[:, off:off + dout]               # (1, dout) f32 -> broadcast add
        off += dout
        y = jnp.dot(h.astype(w.dtype), w, preferred_element_type=jnp.float32) + b
        if layer + 1 < n_total:
            h = _apply_act(y, activation, in_kernel=True)
        else:
            o_ref[...] = jnp.tanh(y).astype(o_ref.dtype)


# ---------------------------------------------------------------------------
# Parameter init / preparation
# ---------------------------------------------------------------------------
def xavier_uniform(key, fan_in, fan_out, dtype=jnp.float32):
    """Matches torch.nn.init.xavier_uniform_ (gain=1)."""
    limit = jnp.sqrt(6.0 / (fan_in + fan_out))
    return jax.random.uniform(
        key, (fan_in, fan_out), dtype=dtype, minval=-limit, maxval=limit
    )


def init_actor_params(key, d_state, d_action, n_layers, n_units):
    """Xavier-uniform weights, zero biases (as in init_weights). Unpadded, f32."""
    dims = [d_state] + [n_units] * n_layers + [d_action]
    params = []
    for i in range(len(dims) - 1):
        key, sub = jax.random.split(key)
        w = xavier_uniform(sub, dims[i], dims[i + 1])
        bias = jnp.zeros((dims[i + 1],), jnp.float32)
        params.append((w, bias))
    return params


def prepare_actor_params(params, param_dtype=jnp.bfloat16):
    """One-time preparation:
      * hidden dims zero-padded to multiples of 128 (lane-dense, clean MXU tiles);
        first-layer input dim and last-layer output dim stay UNPADDED,
      * weights cast to `param_dtype` (bf16 by default -> MXU-native, half HBM/VMEM),
      * all biases concatenated into one (1, sum(dout)) f32 array.
    """
    n = len(params)
    weights, biases = [], []
    for idx, (w, b) in enumerate(params):
        din, dout = w.shape
        dpi = din if idx == 0 else _round_up(din, 128)
        dpo = dout if idx == n - 1 else _round_up(dout, 128)
        wp = jnp.zeros((dpi, dpo), jnp.float32).at[:din, :dout].set(w)
        weights.append(wp.astype(param_dtype))
        biases.append(jnp.zeros((dpo,), jnp.float32).at[:dout].set(b))
    bias_cat = jnp.concatenate(biases)[None, :]
    return tuple(weights), bias_cat


# ---------------------------------------------------------------------------
# Forward pass (single fused pallas_call)
# ---------------------------------------------------------------------------
@functools.partial(jax.jit, static_argnames=("activation",))
def actor_forward(weights, bias_cat, state, activation="swish"):
    """Identical semantics to Actor.forward: hidden layers with `activation`,
    final Linear, then tanh. `weights`/`bias_cat` from prepare_actor_params."""
    B, d_state = state.shape
    out_dims = tuple(int(w.shape[1]) for w in weights)
    d_action = out_dims[-1]

    # Batch tiling:
    #   tiny B      -> one tile;
    #   mid-size B  -> exactly 2 tiles so the "parallel" axis uses both v7x TCs;
    #   large B     -> 512-row tiles (near HBM roofline, ~0.35us/step overhead).
    if B <= 128:
        TB = _round_up(B, 8)
    elif B <= 1024:
        TB = _round_up((B + 1) // 2, 8)
    else:
        TB = 512
    B_pad = _round_up(B, TB)
    num_tiles = B_pad // TB

    x = state.astype(jnp.float32)
    if B_pad != B:
        x = jnp.pad(x, ((0, B_pad - B), (0, 0)))   # cheap row-only pad

    # Grid-invariant params: whole-array blocks, single-buffered.
    param_specs = [
        pl.BlockSpec(w.shape, lambda i: (0, 0), pipeline_mode=pl.Buffered(1))
        for w in weights
    ]
    param_specs.append(
        pl.BlockSpec(bias_cat.shape, lambda i: (0, 0), pipeline_mode=pl.Buffered(1))
    )
    in_specs = [pl.BlockSpec((TB, d_state), lambda i: (i, 0))] + param_specs
    out_spec = pl.BlockSpec((TB, d_action), lambda i: (i, 0))

    # Explicit VMEM budget: single-buffered params + double-buffered x/out tiles
    # + slack for intermediate activations. Clamped to 64 MiB (v7x physical).
    param_bytes = sum(w.size * w.dtype.itemsize for w in weights) + bias_cat.size * 4
    io_tile_bytes = 2 * TB * (max(d_state, 128) + 128) * 4
    act_bytes = 4 * TB * max(out_dims) * 4
    vmem_limit = int(
        min(max(2 * (param_bytes + io_tile_bytes + act_bytes), 32 * 2**20), 64 * 2**20)
    )

    flops = 2 * B_pad * sum(int(w.shape[0]) * int(w.shape[1]) for w in weights)
    transcendentals = B_pad * sum(out_dims)
    bytes_accessed = B_pad * d_state * 4 + param_bytes + B_pad * d_action * 4

    kernel = functools.partial(
        _actor_fused_kernel, out_dims=out_dims, activation=activation
    )

    out = pl.pallas_call(
        kernel,
        out_shape=jax.ShapeDtypeStruct((B_pad, d_action), jnp.float32),
        grid=(num_tiles,),
        in_specs=in_specs,
        out_specs=out_spec,
        compiler_params=pltpu.CompilerParams(
            dimension_semantics=("parallel",),
            vmem_limit_bytes=vmem_limit,
        ),
        cost_estimate=pl.CostEstimate(
            flops=int(flops),
            transcendentals=int(transcendentals),
            bytes_accessed=int(bytes_accessed),
        ),
    )(x, *weights, bias_cat)

    return out[:B] if B_pad != B else out


# ---------------------------------------------------------------------------
def _reference_forward(params, state, activation="swish"):
    """Pure-f32 reference matching the PyTorch module."""
    h = state.astype(jnp.float32)
    n = len(params)
    for i, (w, b) in enumerate(params):
        h = h @ w + b
        if i < n - 1:
            h = _apply_act(h, activation)
    return jnp.tanh(h)


if __name__ == "__main__":
    # Small shapes consistent with the module's forward.
    d_state = 16
    d_action = 4
    n_layers = 2
    n_units = 32
    activation = "swish"

    key = jax.random.PRNGKey(0)
    key_params, key_x1, key_x2 = jax.random.split(key, 3)

    params = init_actor_params(key_params, d_state, d_action, n_layers, n_units)
    weights, bias_cat = prepare_actor_params(params)  # bf16 weights, f32 biases

    # bf16 MXU inputs (f32 accumulation) vs f32 reference -> relaxed tolerance.
    TOL = 2e-2

    # Case 1: tiny batch (single grid tile).
    batch = 8
    state = jax.random.normal(key_x1, (batch, d_state), dtype=jnp.float32)
    out = jax.block_until_ready(actor_forward(weights, bias_cat, state, activation))
    ref = _reference_forward(params, state, activation)
    assert out.shape == (batch, d_action)
    assert jnp.allclose(out, ref, atol=TOL, rtol=TOL), "mismatch vs reference (batch=8)"

    # Case 2: larger, non-multiple batch — exercises batch pad + 2-tile parallel grid.
    batch2 = 300
    state2 = jax.random.normal(key_x2, (batch2, d_state), dtype=jnp.float32)
    out2 = jax.block_until_ready(actor_forward(weights, bias_cat, state2, activation))
    ref2 = _reference_forward(params, state2, activation)
    assert out2.shape == (batch2, d_action)
    assert jnp.allclose(out2, ref2, atol=TOL, rtol=TOL), "mismatch vs reference (batch=300)"

    print("KERNEL_OK")
</pallas_src>

<mosaic_0001>
module attributes {stable_mosaic.version = 11 : i64} {
  func.func @_actor_fused_kernel(%arg0: i32, %arg1: memref<8x16xf32, #tpu.memory_space<vmem>>, %arg2: memref<16x128xbf16, #tpu.memory_space<vmem>>, %arg3: memref<128x128xbf16, #tpu.memory_space<vmem>>, %arg4: memref<128x4xbf16, #tpu.memory_space<vmem>>, %arg5: memref<1x260xf32, #tpu.memory_space<vmem>>, %arg6: memref<8x4xf32, #tpu.memory_space<vmem>>) attributes {dimension_semantics = [#tpu.dimension_semantics<parallel>], iteration_bounds = array<i64: 1>, scalar_prefetch = 0 : i64, scratch_operands = 0 : i64, tpu.core_type = #tpu.core_type<tc>, window_params = [{transform_indices = @transform_0, window_bounds = array<i64: 8, 16>}, {pipeline_mode = #tpu.pipeline_mode<synchronous>, transform_indices = @transform_1, window_bounds = array<i64: 16, 128>}, {pipeline_mode = #tpu.pipeline_mode<synchronous>, transform_indices = @transform_2, window_bounds = array<i64: 128, 128>}, {pipeline_mode = #tpu.pipeline_mode<synchronous>, transform_indices = @transform_3, window_bounds = array<i64: 128, 4>}, {pipeline_mode = #tpu.pipeline_mode<synchronous>, transform_indices = @transform_4, window_bounds = array<i64: 1, 260>}, {transform_indices = @transform_5, window_bounds = array<i64: 8, 4>}]} {
    %c0 = arith.constant 0 : index
    %c0_0 = arith.constant 0 : index
    %0 = vector.load %arg1[%c0, %c0_0] : memref<8x16xf32, #tpu.memory_space<vmem>>, vector<8x16xf32>
    %c0_1 = arith.constant 0 : index
    %c0_2 = arith.constant 0 : index
    %1 = vector.load %arg2[%c0_1, %c0_2] : memref<16x128xbf16, #tpu.memory_space<vmem>>, vector<16x128xbf16>
    %c0_3 = arith.constant 0 : index
    %c0_4 = arith.constant 0 : index
    %2 = vector.load %arg5[%c0_3, %c0_4] : memref<1x260xf32, #tpu.memory_space<vmem>>, vector<1x128xf32>
    %3 = arith.truncf %0 : vector<8x16xf32> to vector<8x16xbf16>
    %cst = arith.constant dense<0.000000e+00> : vector<8x128xf32>
    %4 = tpu.matmul %3, %1, %cst {dimension_numbers = #tpu.dot_dimension_numbers<[1], [0], [0], [1], [0, 0, 1, 1], [], []>} : vector<8x16xbf16>, vector<16x128xbf16>, vector<8x128xf32> -> vector<8x128xf32>
    %5 = vector.broadcast %2 : vector<1x128xf32> to vector<8x128xf32>
    %6 = arith.addf %4, %5 : vector<8x128xf32>
    %cst_5 = arith.constant 0.000000e+00 : f32
    %7 = vector.broadcast %cst_5 : f32 to vector<8x128xf32>
    %8 = arith.subf %7, %6 : vector<8x128xf32>
    %9 = math.exp %8 : vector<8x128xf32>
    %cst_6 = arith.constant 1.000000e+00 : f32
    %10 = vector.broadcast %cst_6 : f32 to vector<8x128xf32>
    %11 = arith.addf %10, %9 : vector<8x128xf32>
    %12 = tpu.reciprocal %11 {approx = true} : vector<8x128xf32> -> vector<8x128xf32>
    %13 = arith.mulf %6, %12 : vector<8x128xf32>
    %c0_7 = arith.constant 0 : index
    %c0_8 = arith.constant 0 : index
    %14 = vector.load %arg3[%c0_7, %c0_8] : memref<128x128xbf16, #tpu.memory_space<vmem>>, vector<128x128xbf16>
    %c0_9 = arith.constant 0 : index
    %c128 = arith.constant 128 : index
    %15 = vector.load %arg5[%c0_9, %c128] : memref<1x260xf32, #tpu.memory_space<vmem>>, vector<1x128xf32>
    %16 = arith.truncf %13 : vector<8x128xf32> to vector<8x128xbf16>
    %cst_10 = arith.constant dense<0.000000e+00> : vector<8x128xf32>
    %17 = tpu.matmul %16, %14, %cst_10 {dimension_numbers = #tpu.dot_dimension_numbers<[1], [0], [0], [1], [0, 0, 1, 1], [], []>} : vector<8x128xbf16>, vector<128x128xbf16>, vector<8x128xf32> -> vector<8x128xf32>
    %18 = vector.broadcast %15 : vector<1x128xf32> to vector<8x128xf32>
    %19 = arith.addf %17, %18 : vector<8x128xf32>
    %cst_11 = arith.constant 0.000000e+00 : f32
    %20 = vector.broadcast %cst_11 : f32 to vector<8x128xf32>
    %21 = arith.subf %20, %19 : vector<8x128xf32>
    %22 = math.exp %21 : vector<8x128xf32>
    %cst_12 = arith.constant 1.000000e+00 : f32
    %23 = vector.broadcast %cst_12 : f32 to vector<8x128xf32>
    %24 = arith.addf %23, %22 : vector<8x128xf32>
    %25 = tpu.reciprocal %24 {approx = true} : vector<8x128xf32> -> vector<8x128xf32>
    %26 = arith.mulf %19, %25 : vector<8x128xf32>
    %c0_13 = arith.constant 0 : index
    %c0_14 = arith.constant 0 : index
    %27 = vector.load %arg4[%c0_13, %c0_14] : memref<128x4xbf16, #tpu.memory_space<vmem>>, vector<128x4xbf16>
    %c0_15 = arith.constant 0 : index
    %c256 = arith.constant 256 : index
    %28 = vector.load %arg5[%c0_15, %c256] : memref<1x260xf32, #tpu.memory_space<vmem>>, vector<1x4xf32>
    %29 = arith.truncf %26 : vector<8x128xf32> to vector<8x128xbf16>
    %cst_16 = arith.constant dense<0.000000e+00> : vector<8x4xf32>
    %30 = tpu.matmul %29, %27, %cst_16 {dimension_numbers = #tpu.dot_dimension_numbers<[1], [0], [0], [1], [0, 0, 1, 1], [], []>} : vector<8x128xbf16>, vector<128x4xbf16>, vector<8x4xf32> -> vector<8x4xf32>
    %31 = vector.broadcast %28 : vector<1x4xf32> to vector<8x4xf32>
    %32 = arith.addf %30, %31 : vector<8x4xf32>
    %33 = math.tanh %32 : vector<8x4xf32>
    %c0_17 = arith.constant 0 : index
    %c0_18 = arith.constant 0 : index
    %34 = vector.load %arg6[%c0_17, %c0_18] : memref<8x4xf32, #tpu.memory_space<vmem>>, vector<8x4xf32>
    tpu.vector_store %arg6[%c0_17, %c0_18], %33 {strides = array<i32>} : memref<8x4xf32, #tpu.memory_space<vmem>>, vector<8x4xf32>,
    return
  }
  func.func @transform_0(%arg0: i32) -> (i32, i32) {
    %c0_i32 = arith.constant 0 : i32
    %c0_i32_0 = arith.constant 0 : i32
    return %arg0, %c0_i32 : i32, i32
  }
  func.func @transform_1(%arg0: i32) -> (i32, i32) {
    %c0_i32 = arith.constant 0 : i32
    %c0_i32_0 = arith.constant 0 : i32
    %c0_i32_1 = arith.constant 0 : i32
    return %c0_i32, %c0_i32_0 : i32, i32
  }
  func.func @transform_2(%arg0: i32) -> (i32, i32) {
    %c0_i32 = arith.constant 0 : i32
    %c0_i32_0 = arith.constant 0 : i32
    %c0_i32_1 = arith.constant 0 : i32
    return %c0_i32, %c0_i32_0 : i32, i32
  }
  func.func @transform_3(%arg0: i32) -> (i32, i32) {
    %c0_i32 = arith.constant 0 : i32
    %c0_i32_0 = arith.constant 0 : i32
    %c0_i32_1 = arith.constant 0 : i32
    return %c0_i32, %c0_i32_0 : i32, i32
  }
  func.func @transform_4(%arg0: i32) -> (i32, i32) {
    %c0_i32 = arith.constant 0 : i32
    %c0_i32_0 = arith.constant 0 : i32
    %c0_i32_1 = arith.constant 0 : i32
    return %c0_i32, %c0_i32_0 : i32, i32
  }
  func.func @transform_5(%arg0: i32) -> (i32, i32) {
    %c0_i32 = arith.constant 0 : i32
    %c0_i32_0 = arith.constant 0 : i32
    return %arg0, %c0_i32 : i32, i32
  }
}

</mosaic_0001>

<bundles_post_ra>
// kernel: actor_forward.1
= control target key start
LH: loop header
LB: loop body
LE: loop exit
PB: predicated region body
PF: predicated region fallthrough
CT: control target
= control target key end

     0   :  { %10 = vsyncpa [#allocation3], 0  ;;  %s483_s18 = smov [#allocation2]   ;;  %s613_s0 = inlined_call_operand.vmem [shape: f32[8,16], index: 0, kind: input, shape index: {}]   ;;  %s614_s1 = inlined_call_operand.hbm [shape: bf16[16,128], index: 1, kind: input, shape index: {}]   ;;  %s615_s2 = inlined_call_operand.vmem [shape: bf16[128,128], index: 2, kind: input, shape index: {}]   ;;  %s616_s3 = inlined_call_operand.vmem [shape: bf16[128,4], index: 3, kind: input, shape index: {}]   ;;  %s617_s4 = inlined_call_operand.vmem [shape: f32[1,260], index: 4, kind: input, shape index: {}]   ;;  %s618_s5 = inlined_call_operand.vmem [shape: f32[8,4], index: 5, kind: output, shape index: {}]  }
   0x1   :  { %s18_s19 = sshll.u32 %s483_s18, 4  ;;  %s459_s22 = scalar_lea.hbm %s614_s1, 128  ;;  %s19_s19 = int_to_ptr.vmem [resolvable:$true] %s18_s19 }
   0x2   :  { %p460_p0 = scmp.ne.s32.totalorder %s614_s1, %s459_s22  ;;  %p463_p1 = scmp.lt.u32.totalorder %s459_s22, %s614_s1 }
   0x4   :  { %p465_p2 = pnand %p463_p1, %p460_p0 }
   0x6   :  { %468 = shalt.err (!%p465_p2)
}
   0x7   :  { %s469_s27 = scalar_lea.vmem %s19_s19, 128  ;;  %p474_p4 = scmp.lt.s32.totalorder %s19_s19, %s19_s19 }
   0x8   :  { %p470_p3 = scmp.ne.s32.totalorder %s19_s19, %s469_s27  ;;  %p475_p5 = scmp.lt.s32.totalorder %s469_s27, %s469_s27 }
   0xa   :  { %p476_p6 = por %p475_p5, %p474_p4 }
   0xc   :  { %p477_p7 = pnand %p476_p6, %p470_p3 }
   0xe   :  { %480 = shalt.err (!%p477_p7)
}
   0xf   :  { %s484_s28 = smov 64   ;;  %s485_s29 = smov 4  }
  0x10   :  { %24 = dma.hbm_to_vmem [thread:$0]  %s614_s1, 128, %s19_s19, [#allocation3], %s484_s28, %s484_s28, %s485_s29  }
  0x11   :  { %481 = dma.done.wait [#allocation3], 128  }
  0x12   :  { %482 = vsyncadd [#allocation3], 4294967168  ;;  %v486_v0 = vmov 0.0   ;;  %vm487_vm0 = vmmov 0   ;;  %v432_v1 = vld [vmem:[#allocation2] sm:$0xff]   ;;  %vm52_vm1 = vcmask 130048  }
  0x13   :  { %381 = vmatprep.subr.bf16.mxu0 %v486_v0  ;;  %383 = vmatprep.mubr.msk.bf16.mxu0 %vm487_vm0, %v486_v0  ;;  %v35_v2 = vld [vmem:[%s613_s0] sm:$0xff]  ;;  %v434_v5 = vld [vmem:[%s615_s2 + $0x8] sm:$0xff]   ;;  %v435_v6 = vld [vmem:[%s615_s2 + $0x10] sm:$0xff]   ;;  %vm333_vm2 = vcmask 31744  }
  0x14   :  { %387 = vmatprep.subr.bf16.mxu1 %v486_v0  ;;  %403 = vmatprep.mubr.msk.bf16.mxu1 %vm487_vm0, %v486_v0  ;;  %v39_v3 = vpack.c.bf16 %v35_v2, %v35_v2  ;;  %v433_v4 = vld [vmem:[%s615_s2] sm:$0xff]   ;;  %v436_v7 = vld [vmem:[%s615_s2 + $0x18] sm:$0xff]   ;;  %v438_v9 = vld [vmem:[%s615_s2 + $0x28] sm:$0xff]  }
  0x15   :  { %382 = vmatpush3.bf16.msra.mxu0 %v432_v1  ;;  %388 = vmatpush3.bf16.msra.mxu1 %v433_v4  ;;  %v437_v8 = vld [vmem:[%s615_s2 + $0x20] sm:$0xff]   ;;  %v439_v10 = vld [vmem:[%s615_s2 + $0x30] sm:$0xff]   ;;  %v440_v11 = vld [vmem:[%s615_s2 + $0x38] sm:$0xff]  }
  0x16   :  { %407 = vmatprep.subr.bf16.mxu0 %v486_v0  ;;  %389 = vmatprep.subr.bf16.mxu1 %v486_v0  ;;  %v340_v12 = vld [vmem:[%s617_s4] ss:$0 sm:$0xff]  ;;  %v442_v26 = vld [vmem:[%s616_s3 + $0x8] sm:$0xff]   ;;  %v443_v27 = vld [vmem:[%s616_s3 + $0x10] sm:$0xff]  }
  0x17   :  { %v441_v25 = vld [vmem:[%s616_s3] sm:$0xff]   ;;  %v444_v28 = vld [vmem:[%s616_s3 + $0x18] sm:$0xff]   ;;  %v446_v30 = vld [vmem:[%s616_s3 + $0x28] sm:$0xff]  }
  0x18   :  { %384 = vmatmul.mubr.msk.bf16.vlgmr.msra.gmra.mrb[0].mxu0 %vm52_vm1, %v39_v3  ;;  %v445_v29 = vld [vmem:[%s616_s3 + $0x20] sm:$0xff]   ;;  %v447_v31 = vld [vmem:[%s616_s3 + $0x30] sm:$0xff]   ;;  %v448_v32 = vld [vmem:[%s616_s3 + $0x38] sm:$0xff]  }
  0x19   :  { %423 = vmatprep.mubr.msk.bf16.mxu0 %vm487_vm0, %v486_v0  ;;  %390 = vmatpush3.bf16.msra.mxu1 %v434_v5  ;;  %v343_v33 = vld [vmem:[%s617_s4 + $0x1] ss:$0 sm:$0xff]  ;;  %v352_v46 = vld [vmem:[%s617_s4 + $0x2] ss:$0 sm:$0xff] }
  0x1a   :  { %391 = vmatprep.subr.bf16.mxu1 %v486_v0  ;;  %408 = vmatpush3.bf16.msra.mxu0 %v441_v25 }
  0x1b   :  { %409 = vmatprep.subr.bf16.mxu0 %v486_v0 }
  0x1d   :  { %392 = vmatpush3.bf16.msra.mxu1 %v435_v6 }
  0x1e   :  { %393 = vmatprep.subr.bf16.mxu1 %v486_v0  ;;  %410 = vmatpush3.bf16.msra.mxu0 %v442_v26 }
  0x1f   :  { %411 = vmatprep.subr.bf16.mxu0 %v486_v0 }
  0x21   :  { %394 = vmatpush3.bf16.msra.mxu1 %v436_v7 }
  0x22   :  { %395 = vmatprep.subr.bf16.mxu1 %v486_v0  ;;  %412 = vmatpush3.bf16.msra.mxu0 %v443_v27 }
  0x23   :  { %413 = vmatprep.subr.bf16.mxu0 %v486_v0 }
  0x25   :  { %396 = vmatpush3.bf16.msra.mxu1 %v437_v8 }
  0x26   :  { %397 = vmatprep.subr.bf16.mxu1 %v486_v0  ;;  %414 = vmatpush3.bf16.msra.mxu0 %v444_v28 }
  0x27   :  { %415 = vmatprep.subr.bf16.mxu0 %v486_v0 }
  0x29   :  { %398 = vmatpush3.bf16.msra.mxu1 %v438_v9 }
  0x2a   :  { %399 = vmatprep.subr.bf16.mxu1 %v486_v0  ;;  %416 = vmatpush3.bf16.msra.mxu0 %v445_v29 }
  0x2b   :  { %417 = vmatprep.subr.bf16.mxu0 %v486_v0 }
  0x2d   :  { %400 = vmatpush3.bf16.msra.mxu1 %v439_v10 }
  0x2e   :  { %401 = vmatprep.subr.bf16.mxu1 %v486_v0  ;;  %418 = vmatpush3.bf16.msra.mxu0 %v446_v30 }
  0x2f   :  { %419 = vmatprep.subr.bf16.mxu0 %v486_v0 }
  0x31   :  { %402 = vmatpush3.bf16.msra.mxu1 %v440_v11 }
  0x32   :  { %420 = vmatpush3.bf16.msra.mxu0 %v447_v31 }
  0x33   :  { %421 = vmatprep.subr.bf16.mxu0 %v486_v0 }
  0x36   :  { %422 = vmatpush3.bf16.msra.mxu0 %v448_v32 }
  0xeb   :  { %v90_v13 = vpop.f32.mrb[0].mxu0 }
  0xec   :  { %v91_v14 = vadd.f32 %v340_v12, %v90_v13  ;;  %v385_v15 = vpop.f32.mrb[1].mxu0 }
  0xed   :  { %v93_v16 = vpop.f32.mrb[2].mxu0 }
  0xee   :  { %v96_v17 = vsub.f32 0.0, %v91_v14  ;;  %v386_v18 = vpop.f32.mrb[3].mxu0 }
  0xf0   :  { %v97_v19 = vmul.f32 1.442695, %v96_v17 }
  0xf2   :  { %449 = vpow2.f32 %v97_v19 }
  0xfc   :  { %v450_v20 = vpop.eup %449 }
  0xfd   :  { %v99_v21 = vadd.f32 1.0, %v450_v20 }
  0xff   :  { %451 = vrcp.f32 %v99_v21 }
 0x109   :  { %v452_v22 = vpop.eup %451 }
 0x10a   :  { %v101_v23 = vmul.f32 %v452_v22, %v91_v14 }
 0x10c   :  { %v119_v24 = vpack.c.bf16 %v101_v23, %v101_v23 }
 0x10e   :  { %404 = vmatmul.mubr.bf16.vlgmr.msra.gmra.mrb[0].mxu1 %v119_v24 }
 0x1e1   :  { %v208_v34 = vpop.f32.mrb[0].mxu1 }
 0x1e2   :  { %v209_v35 = vadd.f32 %v343_v33, %v208_v34  ;;  %v405_v36 = vpop.f32.mrb[1].mxu1 }
 0x1e3   :  { %v211_v37 = vpop.f32.mrb[2].mxu1 }
 0x1e4   :  { %v214_v38 = vsub.f32 0.0, %v209_v35  ;;  %v406_v39 = vpop.f32.mrb[3].mxu1 }
 0x1e6   :  { %v215_v40 = vmul.f32 1.442695, %v214_v38 }
 0x1e8   :  { %453 = vpow2.f32 %v215_v40 }
 0x1f2   :  { %v454_v41 = vpop.eup %453 }
 0x1f3   :  { %v217_v42 = vadd.f32 1.0, %v454_v41 }
 0x1f5   :  { %455 = vrcp.f32 %v217_v42 }
 0x1ff   :  { %v456_v43 = vpop.eup %455 }
 0x200   :  { %v219_v44 = vmul.f32 %v456_v43, %v209_v35 }
 0x202   :  { %v237_v45 = vpack.c.bf16 %v219_v44, %v219_v44 }
 0x204   :  { %424 = vmatmul.mubr.bf16.vlgmr.msra.gmra.mrb[4].mxu0 %v237_v45 }
 0x2d7   :  { %v326_v47 = vpop.f32.mrb[4].mxu0 }
 0x2d8   :  { %v327_v48 = vadd.f32 %v352_v46, %v326_v47  ;;  %v425_v49 = vpop.f32.mrb[5].mxu0 }
 0x2d9   :  { %v329_v50 = vpop.f32.mrb[6].mxu0 }
 0x2da   :  { %457 = vtanh.f32 %v327_v48  ;;  %v426_v51 = vpop.f32.mrb[7].mxu0 }
 0x2e4   :  { %v458_v52 = vpop.eup %457 }
 0x2e5   :  { %334 = vst.msk [vmem:[%s618_s5] sm:$0xff] %vm333_vm2, %v458_v52 }
 0x2e6   :  { %339 = vsyncpa [#allocation3], 1 }

</bundles_post_ra>
